<compile_context>
chip_gen: v5e
topology: v5e:2x2
jax: 0.10.0
libtpu: 0.0.40
codegen_flags: <defaults>
</compile_context>

<pallas_src>
import math

import jax
import jax.numpy as jnp
from jax import lax
from jax.experimental import pallas as pl
from jax.experimental.pallas import tpu as pltpu

_LN_EPS = 1e-5  # nn.LayerNorm default


def _conv_embed_kernel(p_ref, w_ref, affine_ref, o_ref):
    """Fused (patches @ W_aug) -> LayerNorm for one row tile.

    p_ref:      (TN, K+1) bf16   im2col patches with a trailing ones column
    w_ref:      (K+1, E)  bf16   conv weights with the conv bias as last row
    affine_ref: (2, E)    f32    row 0 = gamma, row 1 = beta
    o_ref:      (TN, E)          output tile (cast at store)
    """
    # Single MXU matmul per tile; conv bias arrives via the ones column.
    y = jnp.dot(p_ref[...], w_ref[...], preferred_element_type=jnp.float32)

    # One-pass LayerNorm statistics: E[y], E[y^2] -> var = E[y^2] - mu^2.
    mu = jnp.mean(y, axis=-1, keepdims=True)
    msq = jnp.mean(y * y, axis=-1, keepdims=True)
    var = msq - mu * mu
    inv = lax.rsqrt(var + _LN_EPS)          # EUP slot, off the VALU path

    gamma = affine_ref[0:1, :]
    beta = affine_ref[1:2, :]
    o_ref[...] = ((y - mu) * inv * gamma + beta).astype(o_ref.dtype)


def _im2col(x_nchw, patch_size, stride):
    """(B, C, H, W) -> zero-padded strided patches (B, N, K), K = kh*kw*C."""
    B, C, H, W = x_nchw.shape
    pad = patch_size // 2
    Ho = (H + 2 * pad - patch_size) // stride + 1
    Wo = (W + 2 * pad - patch_size) // stride + 1
    xhwc = jnp.transpose(x_nchw, (0, 2, 3, 1))
    xp = jnp.pad(xhwc, ((0, 0), (pad, pad), (pad, pad), (0, 0)))
    taps = []
    for ki in range(patch_size):
        for kj in range(patch_size):
            taps.append(
                xp[:, ki: ki + stride * (Ho - 1) + 1: stride,
                      kj: kj + stride * (Wo - 1) + 1: stride, :])
    patches = jnp.stack(taps, axis=-2)             # (B, Ho, Wo, kh*kw, C)
    return patches.reshape(B, Ho * Wo, patch_size * patch_size * C), Ho, Wo


def _round_up(n, m):
    return ((n + m - 1) // m) * m


def conv_embedding_forward(x, params, patch_size=7, stride=4,
                           token_tile=512, out_dtype=None,
                           allow_input_fusion=False):
    """Pallas ConvEmbedding forward. Returns (tokens (B, N, E), H_out, W_out).

    token_tile: rows (flattened B*N tokens) per grid step.  512 is a good
                default on all generations; 1024-2048 is fine on v6e/v7x.
    out_dtype:  None -> follow x.dtype (module semantics); jnp.bfloat16 halves
                the output store bytes on this bandwidth-bound kernel.
    """
    assert patch_size > stride, "Set larger patch_size than stride"
    B, C, H, W = x.shape
    E = params["w"].shape[-1]
    K = patch_size * patch_size * C
    out_dtype = x.dtype if out_dtype is None else out_dtype

    # bf16 BEFORE im2col: the materialized patches intermediate (and its
    # re-read by the kernel) moves half the bytes.
    xb = x.astype(jnp.bfloat16)
    patches, Ho, Wo = _im2col(xb, patch_size, stride)
    N = patches.shape[1]
    rows = B * N

    # Fold the conv bias into the GEMM: ones column on patches, bias row on W.
    patches = patches.reshape(rows, K)
    patches = jnp.concatenate(
        [patches, jnp.ones((rows, 1), jnp.bfloat16)], axis=-1)        # (rows, K+1)
    w_aug = jnp.concatenate(
        [params["w"].reshape(K, E), params["b"].reshape(1, E)], axis=0
    ).astype(jnp.bfloat16)                                            # (K+1, E)
    affine = jnp.stack(
        [params["gamma"], params["beta"]], axis=0).astype(jnp.float32)  # (2, E)

    # Flatten (B, N) into one row axis and tile it.  Pad rows so every tile is
    # full; padded rows are zero (LN of zeros is finite thanks to eps) and are
    # sliced off below.  No exact-divisibility requirement on N.
    tn = token_tile if rows >= token_tile else _round_up(rows, 8)
    rows_padded = _round_up(rows, tn)
    if rows_padded != rows:
        patches = jnp.pad(patches, ((0, rows_padded - rows), (0, 0)))

    const = lambda t: (0, 0)
    compiler_params = pltpu.CompilerParams(
        dimension_semantics=("parallel",),
        allow_input_fusion=([True, False, False] if allow_input_fusion
                            else None),
    )

    out = pl.pallas_call(
        _conv_embed_kernel,
        out_shape=jax.ShapeDtypeStruct((rows_padded, E), out_dtype),
        grid_spec=pltpu.PrefetchScalarGridSpec(
            num_scalar_prefetch=0,
            grid=(rows_padded // tn,),
            in_specs=[
                pl.BlockSpec((tn, K + 1), lambda t: (t, 0)),
                pl.BlockSpec((K + 1, E), const),
                pl.BlockSpec((2, E), const),
            ],
            out_specs=pl.BlockSpec((tn, E), lambda t: (t, 0)),
        ),
        compiler_params=compiler_params,
    )(patches, w_aug, affine)

    out = out[:rows].reshape(B, N, E)
    return out, Ho, Wo


def init_params(key, in_chans, embed_dim, patch_size=7):
    kw, kb, kg, kbe = jax.random.split(key, 4)
    fan_in = in_chans * patch_size * patch_size
    w = jax.random.normal(
        kw, (patch_size, patch_size, in_chans, embed_dim), jnp.float32
    ) / math.sqrt(fan_in)                          # HWIO layout
    b = 0.05 * jax.random.normal(kb, (embed_dim,), jnp.float32)
    gamma = 1.0 + 0.1 * jax.random.normal(kg, (embed_dim,), jnp.float32)
    beta = 0.05 * jax.random.normal(kbe, (embed_dim,), jnp.float32)
    return dict(w=w, b=b, gamma=gamma, beta=beta)


def conv_embedding_reference(x, params, patch_size=7, stride=4,
                             round_to_bf16=False):
    """Pure-JAX reference (conv + bias + LayerNorm), for verification."""
    B = x.shape[0]
    pad = patch_size // 2
    E = params["w"].shape[-1]
    xhwc = jnp.transpose(x, (0, 2, 3, 1)).astype(jnp.float32)
    w = params["w"].astype(jnp.float32)
    if round_to_bf16:   # mirror the kernel's bf16 operand rounding
        xhwc = xhwc.astype(jnp.bfloat16).astype(jnp.float32)
        w = w.astype(jnp.bfloat16).astype(jnp.float32)
    y = lax.conv_general_dilated(
        xhwc, w, window_strides=(stride, stride),
        padding=((pad, pad), (pad, pad)),
        dimension_numbers=("NHWC", "HWIO", "NHWC"))
    y = y + params["b"].reshape(1, 1, 1, E)
    Ho, Wo = y.shape[1], y.shape[2]
    y = y.reshape(B, Ho * Wo, E)
    mu = jnp.mean(y, axis=-1, keepdims=True)
    var = jnp.mean((y - mu) ** 2, axis=-1, keepdims=True)
    out = (y - mu) / jnp.sqrt(var + _LN_EPS) * params["gamma"] + params["beta"]
    return out, Ho, Wo


if __name__ == "__main__":
    B, C_in, H, W = 2, 3, 32, 32
    patch_size, stride, embed_dim = 7, 4, 128     # 128 -> lane-dense stores

    key = jax.random.PRNGKey(0)
    kx, kp = jax.random.split(key)
    x = jax.random.normal(kx, (B, C_in, H, W), jnp.float32)
    params = init_params(kp, C_in, embed_dim, patch_size)

    # Default (f32) output: matches module semantics.
    out, Ho, Wo = conv_embedding_forward(x, params, patch_size, stride)
    out = jax.block_until_ready(out)
    assert out.shape == (B, Ho * Wo, embed_dim), out.shape
    assert (Ho, Wo) == (8, 8), (Ho, Wo)
    assert out.dtype == x.dtype, out.dtype

    # Tight check vs a reference that uses the same bf16 operand rounding
    # (isolates kernel bugs from the deliberate bf16 precision choice).
    ref_bf16, _, _ = conv_embedding_reference(
        x, params, patch_size, stride, round_to_bf16=True)
    err_tight = float(jnp.max(jnp.abs(out - ref_bf16)))
    assert err_tight < 3e-3, f"max abs error vs bf16-matched ref {err_tight}"

    # Loose check vs exact f32 module semantics (only bf16 rounding left).
    ref_f32, _, _ = conv_embedding_reference(
        x, params, patch_size, stride, round_to_bf16=False)
    err_full = float(jnp.max(jnp.abs(out - ref_f32)))
    assert err_full < 5e-2, f"max abs error vs f32 reference {err_full}"

    # bf16-output variant (bandwidth-optimal configuration from the review).
    out_bf16, _, _ = conv_embedding_forward(
        x, params, patch_size, stride, out_dtype=jnp.bfloat16)
    out_bf16 = jax.block_until_ready(out_bf16)
    assert out_bf16.dtype == jnp.bfloat16
    err_bf16 = float(jnp.max(jnp.abs(out_bf16.astype(jnp.float32) - ref_f32)))
    assert err_bf16 < 1e-1, f"max abs error (bf16 output) {err_bf16}"

    print("KERNEL_OK")
</pallas_src>

<mosaic_0001>
module attributes {stable_mosaic.version = 11 : i64} {
  func.func @_conv_embed_kernel(%arg0: i32, %arg1: memref<128x148xbf16, #tpu.memory_space<vmem>>, %arg2: memref<148x128xbf16, #tpu.memory_space<vmem>>, %arg3: memref<2x128xf32, #tpu.memory_space<vmem>>, %arg4: memref<128x128xf32, #tpu.memory_space<vmem>>) attributes {dimension_semantics = [#tpu.dimension_semantics<parallel>], iteration_bounds = array<i64: 1>, scalar_prefetch = 0 : i64, scratch_operands = 0 : i64, tpu.core_type = #tpu.core_type<tc>, window_params = [{transform_indices = @transform_0, window_bounds = array<i64: 128, 148>}, {pipeline_mode = #tpu.pipeline_mode<synchronous>, transform_indices = @transform_1, window_bounds = array<i64: 148, 128>}, {pipeline_mode = #tpu.pipeline_mode<synchronous>, transform_indices = @transform_2, window_bounds = array<i64: 2, 128>}, {transform_indices = @transform_3, window_bounds = array<i64: 128, 128>}]} {
    %c0 = arith.constant 0 : index
    %c0_0 = arith.constant 0 : index
    %0 = vector.load %arg1[%c0, %c0_0] : memref<128x148xbf16, #tpu.memory_space<vmem>>, vector<128x148xbf16>
    %c0_1 = arith.constant 0 : index
    %c0_2 = arith.constant 0 : index
    %1 = vector.load %arg2[%c0_1, %c0_2] : memref<148x128xbf16, #tpu.memory_space<vmem>>, vector<148x128xbf16>
    %cst = arith.constant dense<0.000000e+00> : vector<128x128xf32>
    %2 = tpu.matmul %0, %1, %cst {dimension_numbers = #tpu.dot_dimension_numbers<[1], [0], [0], [1], [0, 0, 1, 1], [], []>} : vector<128x148xbf16>, vector<148x128xbf16>, vector<128x128xf32> -> vector<128x128xf32>
    %cst_3 = arith.constant dense<0.000000e+00> : vector<128xf32>
    %3 = vector.multi_reduction <add>, %2, %cst_3 [1] : vector<128x128xf32> to vector<128xf32>
    %4 = vector.shape_cast %3 : vector<128xf32> to vector<128x1xf32>
    %cst_4 = arith.constant 1.280000e+02 : f32
    %5 = vector.broadcast %cst_4 : f32 to vector<128x1xf32>
    %6 = arith.divf %4, %5 : vector<128x1xf32>
    %7 = arith.mulf %2, %2 : vector<128x128xf32>
    %cst_5 = arith.constant dense<0.000000e+00> : vector<128xf32>
    %8 = vector.multi_reduction <add>, %7, %cst_5 [1] : vector<128x128xf32> to vector<128xf32>
    %9 = vector.shape_cast %8 : vector<128xf32> to vector<128x1xf32>
    %cst_6 = arith.constant 1.280000e+02 : f32
    %10 = vector.broadcast %cst_6 : f32 to vector<128x1xf32>
    %11 = arith.divf %9, %10 : vector<128x1xf32>
    %12 = arith.mulf %6, %6 : vector<128x1xf32>
    %13 = arith.subf %11, %12 : vector<128x1xf32>
    %cst_7 = arith.constant 9.99999974E-6 : f32
    %14 = vector.broadcast %cst_7 : f32 to vector<128x1xf32>
    %15 = arith.addf %13, %14 : vector<128x1xf32>
    %16 = math.rsqrt %15 : vector<128x1xf32>
    %c0_8 = arith.constant 0 : index
    %c0_9 = arith.constant 0 : index
    %17 = vector.load %arg3[%c0_8, %c0_9] : memref<2x128xf32, #tpu.memory_space<vmem>>, vector<1x128xf32>
    %c1 = arith.constant 1 : index
    %c0_10 = arith.constant 0 : index
    %18 = vector.load %arg3[%c1, %c0_10] : memref<2x128xf32, #tpu.memory_space<vmem>>, vector<1x128xf32>
    %19 = vector.broadcast %6 : vector<128x1xf32> to vector<128x128xf32>
    %20 = arith.subf %2, %19 : vector<128x128xf32>
    %21 = vector.broadcast %16 : vector<128x1xf32> to vector<128x128xf32>
    %22 = arith.mulf %20, %21 : vector<128x128xf32>
    %23 = vector.broadcast %17 : vector<1x128xf32> to vector<128x128xf32>
    %24 = arith.mulf %22, %23 : vector<128x128xf32>
    %25 = vector.broadcast %18 : vector<1x128xf32> to vector<128x128xf32>
    %26 = arith.addf %24, %25 : vector<128x128xf32>
    %c0_11 = arith.constant 0 : index
    %c0_12 = arith.constant 0 : index
    %27 = vector.load %arg4[%c0_11, %c0_12] : memref<128x128xf32, #tpu.memory_space<vmem>>, vector<128x128xf32>
    tpu.vector_store %arg4[%c0_11, %c0_12], %26 {strides = array<i32>} : memref<128x128xf32, #tpu.memory_space<vmem>>, vector<128x128xf32>,
    return
  }
  func.func @transform_0(%arg0: i32) -> (i32, i32) {
    %c0_i32 = arith.constant 0 : i32
    %c0_i32_0 = arith.constant 0 : i32
    return %arg0, %c0_i32 : i32, i32
  }
  func.func @transform_1(%arg0: i32) -> (i32, i32) {
    %c0_i32 = arith.constant 0 : i32
    %c0_i32_0 = arith.constant 0 : i32
    %c0_i32_1 = arith.constant 0 : i32
    return %c0_i32, %c0_i32_0 : i32, i32
  }
  func.func @transform_2(%arg0: i32) -> (i32, i32) {
    %c0_i32 = arith.constant 0 : i32
    %c0_i32_0 = arith.constant 0 : i32
    %c0_i32_1 = arith.constant 0 : i32
    return %c0_i32, %c0_i32_0 : i32, i32
  }
  func.func @transform_3(%arg0: i32) -> (i32, i32) {
    %c0_i32 = arith.constant 0 : i32
    %c0_i32_0 = arith.constant 0 : i32
    return %arg0, %c0_i32 : i32, i32
  }
}

</mosaic_0001>

<bundles_post_ra>
// kernel: tpu_custom_call.1
= control target key start
LH: loop header
LB: loop body
LE: loop exit
PB: predicated region body
PF: predicated region fallthrough
CT: control target
= control target key end

     0   :  { %vm205_vm0 = vcmask 1041408   ;;  %s1398_s0 = inlined_call_operand.vmem [shape: bf16[128,148], index: 0, kind: input, shape index: {}]   ;;  %s1399_s1 = inlined_call_operand.vmem [shape: bf16[148,128], index: 1, kind: input, shape index: {}]   ;;  %s1400_s2 = inlined_call_operand.vmem [shape: f32[2,128], index: 2, kind: input, shape index: {}]   ;;  %s1401_s3 = inlined_call_operand.hbm [shape: f32[128,128], index: 3, kind: output, shape index: {}]  }
   0x1   :  { %v867_v0 = vld [vmem:[%s1399_s1 + $0x38] sm:$0xff]  ;;  %v50_v1 = vld [vmem:[%s1399_s1 + $0x48] sm:$0x3]  ;;  %v866_v3 = vld [vmem:[%s1399_s1 + $0x30] sm:$0xff] }
   0x2   :  { %v160_v2 = vunpack.c.l.b16 %v50_v1  ;;  %209 = vmatpush.bf16.msra.mxu0 %v867_v0  ;;  %869 = vmatpush.bf16.msra.mxu2 %v867_v0  ;;  %v868_v6 = vld [vmem:[%s1399_s1 + $0x40] sm:$0xff]  ;;  %v865_v7 = vld [vmem:[%s1399_s1 + $0x28] sm:$0xff]  ;;  %v854_v10 = vld [vmem:[%s1398_s0 + $0x54] sm:$0xf] }
   0x3   :  { %v844_v8 = vld [vmem:[%s1398_s0 + $0x4] sm:$0xf]  ;;  %v740_v9 = vld [vmem:[%s1398_s0 + $0x8] sm:$0xf0]  ;;  %v780_v11 = vld [vmem:[%s1398_s0 + $0x58] sm:$0xf0] }
   0x4   :  { %v170_v4 = vpack.c.b16 %v160_v2, %v160_v2 }
   0x6   :  { %v207_v5 = vsel %vm205_vm0, %v170_v4, 0  ;;  %210 = vmatpush.bf16.msra.mxu0 %v866_v3  ;;  %870 = vmatpush.bf16.msra.mxu2 %v866_v3 }
   0x7   :  { %264 = vmatpush.bf16.msra.mxu1 %v207_v5  ;;  %877 = vmatpush.bf16.msra.mxu3 %v207_v5 }
   0x8   :  { %8 = vsyncpa [#allocation3], 0  ;;  %v743_v12 = vor.u32 %v844_v8, %v740_v9  ;;  %vm180_vm1 = vcmask 162816   ;;  %v864_v13 = vld [vmem:[%s1399_s1 + $0x20] sm:$0xff]  ;;  %v783_v14 = vor.u32 %v854_v10, %v780_v11  ;;  %v863_v15 = vld [vmem:[%s1399_s1 + $0x18] sm:$0xff]  ;;  %s724_s19 = sshll.u32 %s1401_s3, 4  ;;  %s725_s19 = int_to_ptr.hbm [resolvable:$true] %s724_s19 }
   0x9   :  { %v862_v16 = vld [vmem:[%s1399_s1 + $0x10] sm:$0xff]  ;;  %v861_v17 = vld [vmem:[%s1399_s1 + $0x8] sm:$0xff]  ;;  %v748_v19 = vld [vmem:[%s1398_s0 + $0x18] sm:$0xf0]  ;;  %s947_s20 = smov 128   ;;  %s948_s21 = smov 8  }
   0xa   :  { %211 = vmatpush.bf16.msra.mxu0 %v865_v7  ;;  %871 = vmatpush.bf16.msra.mxu2 %v865_v7  ;;  %v846_v18 = vld [vmem:[%s1398_s0 + $0x14] sm:$0xf]  ;;  %v856_v20 = vld [vmem:[%s1398_s0 + $0x64] sm:$0xf]  ;;  %v788_v21 = vld [vmem:[%s1398_s0 + $0x68] sm:$0xf0] }
   0xb   :  { %265 = vmatpush.bf16.msra.mxu1 %v868_v6  ;;  %878 = vmatpush.bf16.msra.mxu3 %v868_v6  ;;  %v751_v22 = vor.u32 %v846_v18, %v748_v19  ;;  %v860_v23 = vld [vmem:[%s1399_s1] sm:$0xff]  ;;  %v845_v25 = vld [vmem:[%s1398_s0 + $0x4] sm:$0xf0]  ;;  %v791_v26 = vor.u32 %v856_v20, %v788_v21  ;;  %v756_v32 = vld [vmem:[%s1398_s0 + $0x28] sm:$0xf0] }
   0xc   :  { %v738_v24 = vld [vmem:[%s1398_s0] sm:$0xf]  ;;  %v853_v28 = vld [vmem:[%s1398_s0 + $0x44] sm:$0xf0]  ;;  %v848_v31 = vld [vmem:[%s1398_s0 + $0x24] sm:$0xf] }
   0xd   :  { %v770_v27 = vld [vmem:[%s1398_s0 + $0x40] sm:$0xf]  ;;  %v739_v29 = vor.u32 %v845_v25, %v738_v24  ;;  %v759_v33 = vor.u32 %v848_v31, %v756_v32  ;;  %v746_v34 = vld [vmem:[%s1398_s0 + $0x10] sm:$0xf]  ;;  %v847_v35 = vld [vmem:[%s1398_s0 + $0x14] sm:$0xf0] }
   0xe   :  { %836 = vmatmul.msk.bf16.vlgmr.msra.gmra.mxu1 %vm180_vm1, %v743_v12  ;;  %212 = vmatpush.bf16.msra.mxu0 %v864_v13  ;;  %v771_v30 = vor.u32 %v853_v28, %v770_v27  ;;  %v778_v36 = vld [vmem:[%s1398_s0 + $0x50] sm:$0xf]  ;;  %v855_v37 = vld [vmem:[%s1398_s0 + $0x54] sm:$0xf0]  ;;  %v747_v38 = vor.u32 %v847_v35, %v746_v34  ;;  %v858_v40 = vld [vmem:[%s1398_s0 + $0x74] sm:$0xf] }
   0xf   :  { %841 = vmatmul.msk.bf16.vlgmr.msra.gmra.mxu3 %vm180_vm1, %v783_v14  ;;  %872 = vmatpush.bf16.msra.mxu2 %v864_v13  ;;  %v779_v39 = vor.u32 %v855_v37, %v778_v36  ;;  %v796_v41 = vld [vmem:[%s1398_s0 + $0x78] sm:$0xf0]  ;;  %v850_v43 = vld [vmem:[%s1398_s0 + $0x34] sm:$0xf]  ;;  %v754_v46 = vld [vmem:[%s1398_s0 + $0x20] sm:$0xf] }
  0x10   :  { %v799_v42 = vor.u32 %v858_v40, %v796_v41  ;;  %v764_v44 = vld [vmem:[%s1398_s0 + $0x38] sm:$0xf0]  ;;  %v849_v47 = vld [vmem:[%s1398_s0 + $0x24] sm:$0xf0]  ;;  %v786_v48 = vld [vmem:[%s1398_s0 + $0x60] sm:$0xf] }
  0x11   :  { %v767_v45 = vor.u32 %v850_v43, %v764_v44  ;;  %v857_v49 = vld [vmem:[%s1398_s0 + $0x64] sm:$0xf0]  ;;  %v755_v50 = vor.u32 %v849_v47, %v754_v46  ;;  %v852_v52 = vld [vmem:[%s1398_s0 + $0x44] sm:$0xf]  ;;  %v772_v53 = vld [vmem:[%s1398_s0 + $0x48] sm:$0xf0] }
  0x12   :  { %213 = vmatpush.bf16.msra.mxu0 %v863_v15  ;;  %v787_v51 = vor.u32 %v857_v49, %v786_v48  ;;  %v775_v54 = vor.u32 %v852_v52, %v772_v53  ;;  %v762_v55 = vld [vmem:[%s1398_s0 + $0x30] sm:$0xf]  ;;  %v851_v56 = vld [vmem:[%s1398_s0 + $0x34] sm:$0xf0] }
  0x13   :  { %873 = vmatpush.bf16.msra.mxu2 %v863_v15  ;;  %v794_v57 = vld [vmem:[%s1398_s0 + $0x70] sm:$0xf]  ;;  %v859_v58 = vld [vmem:[%s1398_s0 + $0x74] sm:$0xf0]  ;;  %v763_v59 = vor.u32 %v851_v56, %v762_v55 }
  0x14   :  { %v795_v60 = vor.u32 %v859_v58, %v794_v57 }
  0x16   :  { %214 = vmatpush.bf16.msra.mxu0 %v862_v16 }
  0x17   :  { %874 = vmatpush.bf16.msra.mxu2 %v862_v16 }
  0x1a   :  { %215 = vmatpush.bf16.msra.mxu0 %v861_v17 }
  0x1b   :  { %875 = vmatpush.bf16.msra.mxu2 %v861_v17 }
  0x1e   :  { %837 = vmatmul.msk.bf16.gmra.mxu1 %vm180_vm1, %v751_v22  ;;  %216 = vmatpush.bf16.msra.mxu0 %v860_v23 }
  0x1f   :  { %842 = vmatmul.msk.bf16.gmra.mxu3 %vm180_vm1, %v791_v26  ;;  %876 = vmatpush.bf16.msra.mxu2 %v860_v23 }
  0x21   :  { %217 = vmatmul.bf16.vlgmr.msra.gmra.mxu0 %v739_v29 }
  0x22   :  { %237 = vmatmul.bf16.vlgmr.msra.gmra.mxu2 %v771_v30 }
  0x2e   :  { %838 = vmatmul.msk.bf16.gmra.mxu1 %vm180_vm1, %v759_v33 }
  0x2f   :  { %843 = vmatmul.msk.bf16.gmra.mxu3 %vm180_vm1, %v799_v42 }
  0x31   :  { %222 = vmatmul.bf16.gmra.mxu0 %v747_v38 }
  0x32   :  { %242 = vmatmul.bf16.gmra.mxu2 %v779_v39 }
  0x3e   :  { %839 = vmatmul.msk.bf16.gmra.mxu1 %vm180_vm1, %v767_v45 }
  0x41   :  { %227 = vmatmul.bf16.gmra.mxu0 %v755_v50 }
  0x42   :  { %247 = vmatmul.bf16.gmra.mxu2 %v787_v51 }
  0x4e   :  { %840 = vmatmul.msk.bf16.gmra.mxu1 %vm180_vm1, %v775_v54 }
  0x51   :  { %232 = vmatmul.bf16.gmra.mxu0 %v763_v59 }
  0x52   :  { %252 = vmatmul.bf16.gmra.mxu2 %v795_v60 }
  0x8b   :  { %v267_v61 = vpop.f32.mrf.mxu1 }
  0x92   :  { %v292_v13 = vpop.f32.mrf.mxu3 }
  0x93   :  { %v269_v62 = vpop.f32.mrf.mxu1 }
  0x9a   :  { %v294_v19 = vpop.f32.mrf.mxu3 }
  0x9b   :  { %v272_v63 = vpop.f32.mrf.mxu1 }
  0x9e   :  { %v218_v0 = vpop.f32.mrf.mxu0 }
  0x9f   :  { %v1103_v1 = vadd.f32 %v267_v61, %v218_v0  ;;  %v945_v61 = vmov 128.0  }
  0xa0   :  { %885 = vrcp.f32 %v945_v61 }
  0xa1   :  { %307 = vadd.xlane.f32.xlu0 %v1103_v1  ;;  %v362_v2 = vmul.f32 %v1103_v1, %v1103_v1 }
  0xa2   :  { %v297_v26 = vpop.f32.mrf.mxu3 }
  0xa3   :  { %v274_v3 = vpop.f32.mrf.mxu1  ;;  %378 = vadd.xlane.f32.xlu1 %v362_v2 }
  0xa5   :  { %v238_v4 = vpop.f32.mrf.mxu2 }
  0xa6   :  { %v220_v5 = vpop.f32.mrf.mxu0 }
  0xa7   :  { %v1108_v6 = vadd.f32 %v269_v62, %v220_v5  ;;  %v886_v62 = vpop.eup %885 }
  0xa8   :  { %vm344_vm2 = vweird.f32 %v886_v62 }
  0xa9   :  { %309 = vadd.xlane.f32.xlu0 %v1108_v6  ;;  %v363_v7 = vmul.f32 %v1108_v6, %v1108_v6 }
  0xaa   :  { %v299_v40 = vpop.f32.mrf.mxu3 }
  0xab   :  { %v277_v8 = vpop.f32.mrf.mxu1  ;;  %380 = vadd.xlane.f32.xlu2 %v363_v7 }
  0xad   :  { %v240_v9 = vpop.f32.mrf.mxu2 }
  0xae   :  { %v223_v10 = vpop.f32.mrf.mxu0 }
  0xaf   :  { %v1113_v11 = vadd.f32 %v272_v63, %v223_v10  ;;  %v340_v63 = vmul.f32 128.0, %v886_v62 }
  0xb1   :  { %311 = vadd.xlane.f32.xlu1 %v1113_v11  ;;  %v364_v12 = vmul.f32 %v1113_v11, %v1113_v11  ;;  %v341_v0 = vsub.f32 1.0, %v340_v63 }
  0xb2   :  { %v302_v49 = vpop.f32.mrf.mxu3 }
  0xb3   :  { %v279_v14 = vpop.f32.mrf.mxu1  ;;  %382 = vadd.xlane.f32.xlu0 %v364_v12  ;;  %v342_v2 = vmul.f32 %v886_v62, %v341_v0 }
  0xb5   :  { %v243_v15 = vpop.f32.mrf.mxu2 }
  0xb6   :  { %v1118_v16 = vadd.f32 %v292_v13, %v243_v15  ;;  %v225_v17 = vpop.f32.mrf.mxu0 }
  0xb7   :  { %v1125_v23 = vadd.f32 %v274_v3, %v225_v17  ;;  %v343_v3 = vadd.f32 %v886_v62, %v342_v2 }
  0xb8   :  { %v372_v18 = vmul.f32 %v1118_v16, %v1118_v16 }
  0xb9   :  { %327 = vadd.xlane.f32.xlu1 %v1118_v16  ;;  %v365_v30 = vmul.f32 %v1125_v23, %v1125_v23 }
  0xba   :  { %398 = vadd.xlane.f32.xlu2 %v372_v18  ;;  %v304_v55 = vpop.f32.mrf.mxu3 }
  0xbb   :  { %v282_v20 = vpop.f32.mrf.mxu1 }
  0xbd   :  { %v245_v21 = vpop.f32.mrf.mxu2 }
  0xbe   :  { %v1123_v22 = vadd.f32 %v294_v19, %v245_v21  ;;  %v228_v24 = vpop.f32.mrf.mxu0 }
  0xbf   :  { %v1135_v31 = vadd.f32 %v277_v8, %v228_v24 }
  0xc0   :  { %v373_v25 = vmul.f32 %v1123_v22, %v1123_v22 }
  0xc1   :  { %313 = vadd.xlane.f32.xlu1 %v1125_v23  ;;  %v366_v35 = vmul.f32 %v1135_v31, %v1135_v31 }
  0xc2   :  { %329 = vadd.xlane.f32.xlu2 %v1123_v22  ;;  %400 = vadd.xlane.f32.xlu0 %v373_v25 }
  0xc3   :  { %v284_v29 = vpop.f32.mrf.mxu1 }
  0xc5   :  { %v248_v27 = vpop.f32.mrf.mxu2 }
  0xc6   :  { %v1131_v28 = vadd.f32 %v297_v26, %v248_v27  ;;  %v230_v32 = vpop.f32.mrf.mxu0 }
  0xc7   :  { %v1139_v33 = vadd.f32 %v279_v14, %v230_v32 }
  0xc8   :  { %v374_v34 = vmul.f32 %v1131_v28, %v1131_v28 }
  0xc9   :  { %384 = vadd.xlane.f32.xlu1 %v365_v30  ;;  %v367_v36 = vmul.f32 %v1139_v33, %v1139_v33 }
  0xca   :  { %315 = vadd.xlane.f32.xlu2 %v1135_v31  ;;  %331 = vadd.xlane.f32.xlu0 %v1131_v28 }
  0xcb   :  { %v287_v37 = vpop.f32.mrf.mxu1 }
  0xcc   :  { %v1147_v38 = vadd.f32 %v287_v37, %v238_v4  ;;  %v1183_v4 = vsel %vm344_vm2, %v886_v62, %v343_v3 }
  0xcd   :  { %v250_v39 = vpop.f32.mrf.mxu2 }
  0xce   :  { %v1149_v41 = vadd.f32 %v299_v40, %v250_v39  ;;  %v233_v42 = vpop.f32.mrf.mxu0  ;;  %v370_v43 = vmul.f32 %v1147_v38, %v1147_v38 }
  0xcf   :  { %v1155_v44 = vadd.f32 %v282_v20, %v233_v42 }
  0xd0   :  { %v375_v59 = vmul.f32 %v1149_v41, %v1149_v41 }
  0xd1   :  { %402 = vadd.xlane.f32.xlu1 %v374_v34  ;;  %v368_v45 = vmul.f32 %v1155_v44, %v1155_v44 }
  0xd2   :  { %386 = vadd.xlane.f32.xlu2 %v366_v35  ;;  %388 = vadd.xlane.f32.xlu0 %v367_v36 }
  0xd3   :  { %v289_v46 = vpop.f32.mrf.mxu1 }
  0xd4   :  { %v1161_v47 = vadd.f32 %v289_v46, %v240_v9 }
  0xd5   :  { %v253_v48 = vpop.f32.mrf.mxu2 }
  0xd6   :  { %v1163_v50 = vadd.f32 %v302_v49, %v253_v48  ;;  %v371_v51 = vmul.f32 %v1161_v47, %v1161_v47  ;;  %v235_v52 = vpop.f32.mrf.mxu0  ;;  %v1199_v48 = vld [vmem:[%s1400_s2] ss:$0 sm:$0xff] }
  0xd7   :  { %v1169_v53 = vadd.f32 %v284_v29, %v235_v52 }
  0xd8   :  { %v376_v60 = vmul.f32 %v1163_v50, %v1163_v50 }
  0xd9   :  { %333 = vadd.xlane.f32.xlu1 %v1149_v41  ;;  %v369_v57 = vmul.f32 %v1169_v53, %v1169_v53 }
  0xda   :  { %317 = vadd.xlane.f32.xlu2 %v1139_v33  ;;  %394 = vadd.xlane.f32.xlu0 %v370_v43 }
  0xdd   :  { %v255_v54 = vpop.f32.mrf.mxu2 }
  0xde   :  { %v1171_v56 = vadd.f32 %v304_v55, %v255_v54  ;;  %v1207_v55 = vld [vmem:[%s1400_s2 + $0x1] ss:$0 sm:$0xff]  ;;  %s946_s2 = smov [#allocation2]  }
  0xdf   :  { %s722_s16 = sshll.u32 %s946_s2, 4  ;;  %s723_s16 = int_to_ptr.vmem [resolvable:$true] %s722_s16 }
  0xe0   :  { %v377_v58 = vmul.f32 %v1171_v56, %v1171_v56 }
  0xe1   :  { %390 = vadd.xlane.f32.xlu1 %v368_v45 }
  0xe2   :  { %323 = vadd.xlane.f32.xlu2 %v1147_v38  ;;  %319 = vadd.xlane.f32.xlu0 %v1155_v44 }
  0xe9   :  { %396 = vadd.xlane.f32.xlu1 %v371_v51 }
  0xea   :  { %335 = vadd.xlane.f32.xlu2 %v1163_v50  ;;  %325 = vadd.xlane.f32.xlu0 %v1161_v47 }
  0xf1   :  { %321 = vadd.xlane.f32.xlu1 %v1169_v53 }
  0xf2   :  { %392 = vadd.xlane.f32.xlu2 %v369_v57  ;;  %337 = vadd.xlane.f32.xlu0 %v1171_v56 }
  0xf9   :  { %408 = vadd.xlane.f32.xlu1 %v377_v58 }
  0xfa   :  { %404 = vadd.xlane.f32.xlu2 %v375_v59  ;;  %406 = vadd.xlane.f32.xlu0 %v376_v60 }
 0x114   :  { %v308_v5 = vpop.xlane.xlu0 %307 }
 0x115   :  { %v346_v7 = vmul.f32 %v1183_v4, %v308_v5 }
 0x116   :  { %v379_v8 = vpop.xlane.xlu1 %378 }
 0x117   :  { %v426_v9 = vmul.f32 %v346_v7, %v346_v7  ;;  %v410_v10 = vmul.f32 %v379_v8, %v1183_v4  ;;  %v636_v46 = vsub.f32 %v1103_v1, %v346_v7 }
 0x119   :  { %v442_v12 = vsub.f32 %v410_v10, %v426_v9 }
 0x11b   :  { %v458_v13 = vadd.f32 1e-05, %v442_v12 }
 0x11c   :  { %v310_v14 = vpop.xlane.xlu0 %309 }
 0x11d   :  { %887 = vrsqrt.f32 %v458_v13  ;;  %v347_v15 = vmul.f32 %v1183_v4, %v310_v14  ;;  %vm480_vm4 = vweird.f32 %v458_v13 }
 0x11e   :  { %v381_v17 = vpop.xlane.xlu2 %380 }
 0x11f   :  { %v427_v18 = vmul.f32 %v347_v15, %v347_v15  ;;  %v411_v19 = vmul.f32 %v381_v17, %v1183_v4  ;;  %v637_v8 = vsub.f32 %v1108_v6, %v347_v15 }
 0x121   :  { %v443_v20 = vsub.f32 %v411_v19, %v427_v18 }
 0x123   :  { %v888_v21 = vpop.eup %887  ;;  %v459_v24 = vadd.f32 1e-05, %v443_v20 }
 0x124   :  { %v475_v25 = vmul.f32 %v888_v21, %v458_v13  ;;  %v312_v26 = vpop.xlane.xlu1 %311  ;;  %vm481_vm3 = vweird.f32 %v888_v21 }
 0x125   :  { %889 = vrsqrt.f32 %v459_v24  ;;  %v1190_v27 = vmul.f32 %v1183_v4, %v312_v26  ;;  %vm482_vm5 = vmor %vm480_vm4, %vm481_vm3  ;;  %vm490_vm7 = vweird.f32 %v459_v24 }
 0x126   :  { %v476_v29 = vmul.f32 %v888_v21, %v475_v25  ;;  %v383_v30 = vpop.xlane.xlu0 %382 }
 0x127   :  { %v428_v32 = vmul.f32 %v1190_v27, %v1190_v27  ;;  %v412_v34 = vmul.f32 %v383_v30, %v1183_v4 }
 0x128   :  { %v477_v35 = vmul.f32 0.5, %v476_v29 }
 0x129   :  { %v444_v36 = vsub.f32 %v412_v34, %v428_v32 }
 0x12a   :  { %v478_v37 = vsub.f32 1.5, %v477_v35  ;;  %v638_v35 = vsub.f32 %v1113_v11, %v1190_v27 }
 0x12b   :  { %v890_v39 = vpop.eup %889  ;;  %v460_v40 = vadd.f32 1e-05, %v444_v36 }
 0x12c   :  { %v479_v42 = vmul.f32 %v888_v21, %v478_v37  ;;  %v485_v43 = vmul.f32 %v890_v39, %v459_v24  ;;  %v328_v45 = vpop.xlane.xlu1 %327  ;;  %vm491_vm6 = vweird.f32 %v890_v39 }
 0x12d   :  { %891 = vrsqrt.f32 %v460_v40  ;;  %v399_v49 = vpop.xlane.xlu2 %398  ;;  %v1202_v51 = vmul.f32 %v1183_v4, %v328_v45  ;;  %vm492_vm8 = vmor %vm490_vm7, %vm491_vm6  ;;  %vm500_vm10 = vweird.f32 %v460_v40 }
 0x12e   :  { %v483_v52 = vsel %vm482_vm5, %v888_v21, %v479_v42  ;;  %v486_v54 = vmul.f32 %v890_v39, %v485_v43  ;;  %v420_v1 = vmul.f32 %v399_v49, %v1183_v4 }
 0x12f   :  { %v652_v57 = vmul.f32 %v636_v46, %v483_v52  ;;  %v436_v58 = vmul.f32 %v1202_v51, %v1202_v51 }
 0x130   :  { %v487_v59 = vmul.f32 0.5, %v486_v54 }
 0x131   :  { %v669_v60 = vmul.f32 %v1199_v48, %v652_v57  ;;  %v452_v61 = vsub.f32 %v420_v1, %v436_v58 }
 0x132   :  { %v488_v62 = vsub.f32 1.5, %v487_v59 }
 0x133   :  { %v892_v63 = vpop.eup %891  ;;  %v686_v0 = vadd.f32 %v1207_v55, %v669_v60  ;;  %v468_v2 = vadd.f32 1e-05, %v452_v61  ;;  %v646_v61 = vsub.f32 %v1118_v16, %v1202_v51 }
 0x134   :  { %v489_v3 = vmul.f32 %v890_v39, %v488_v62  ;;  %v495_v5 = vmul.f32 %v892_v63, %v460_v40  ;;  %v314_v7 = vpop.xlane.xlu1 %313  ;;  %vm501_vm9 = vweird.f32 %v892_v63 }
 0x135   :  { %702 = vst [vmem:[#allocation2] sm:$0xff] %v686_v0  ;;  %893 = vrsqrt.f32 %v468_v2  ;;  %v330_v9 = vpop.xlane.xlu2 %329  ;;  %v401_v10 = vpop.xlane.xlu0 %400  ;;  %v1223_v6 = vmul.f32 %v1183_v4, %v314_v7  ;;  %vm502_vm11 = vmor %vm500_vm10, %vm501_vm9  ;;  %vm580_vm13 = vweird.f32 %v468_v2 }
 0x136   :  { %v493_v12 = vsel %vm492_vm8, %v890_v39, %v489_v3  ;;  %v496_v13 = vmul.f32 %v892_v63, %v495_v5  ;;  %v1216_v14 = vmul.f32 %v1183_v4, %v330_v9  ;;  %v421_v20 = vmul.f32 %v401_v10, %v1183_v4 }
 0x137   :  { %v653_v17 = vmul.f32 %v637_v8, %v493_v12  ;;  %v429_v36 = vmul.f32 %v1223_v6, %v1223_v6 }
 0x138   :  { %v497_v18 = vmul.f32 0.5, %v496_v13  ;;  %v437_v19 = vmul.f32 %v1216_v14, %v1216_v14 }
 0x139   :  { %v670_v21 = vmul.f32 %v1199_v48, %v653_v17 }
 0x13a   :  { %v498_v15 = vsub.f32 1.5, %v497_v18  ;;  %v453_v24 = vsub.f32 %v421_v20, %v437_v19 }
 0x13b   :  { %v894_v25 = vpop.eup %893  ;;  %v687_v26 = vadd.f32 %v1207_v55, %v670_v21 }
 0x13c   :  { %v499_v29 = vmul.f32 %v892_v63, %v498_v15  ;;  %v575_v30 = vmul.f32 %v894_v25, %v468_v2  ;;  %v469_v32 = vadd.f32 1e-05, %v453_v24  ;;  %v385_v34 = vpop.xlane.xlu1 %384  ;;  %vm581_vm12 = vweird.f32 %v894_v25 }
 0x13d   :  { %703 = vst [vmem:[#allocation2 + $0x8] sm:$0xff] %v687_v26  ;;  %v316_v37 = vpop.xlane.xlu2 %315  ;;  %v332_v39 = vpop.xlane.xlu0 %331  ;;  %v413_v42 = vmul.f32 %v385_v34, %v1183_v4  ;;  %vm582_vm14 = vmor %vm580_vm13, %vm581_vm12  ;;  %v647_v34 = vsub.f32 %v1123_v22, %v1216_v14 }
 0x13e   :  { %v503_v43 = vsel %vm502_vm11, %v892_v63, %v499_v29  ;;  %v576_v45 = vmul.f32 %v894_v25, %v575_v30  ;;  %895 = vrsqrt.f32 %v469_v32  ;;  %v1233_v54 = vmul.f32 %v1183_v4, %v332_v39 }
 0x13f   :  { %v654_v46 = vmul.f32 %v638_v35, %v503_v43  ;;  %v445_v40 = vsub.f32 %v413_v42, %v429_v36  ;;  %v1236_v27 = vmul.f32 %v1183_v4, %v316_v37  ;;  %vm590_vm0 = vweird.f32 %v469_v32 }
 0x140   :  { %v577_v49 = vmul.f32 0.5, %v576_v45  ;;  %v438_v63 = vmul.f32 %v1233_v54, %v1233_v54 }
 0x141   :  { %v671_v52 = vmul.f32 %v1199_v48, %v654_v46  ;;  %v461_v57 = vadd.f32 1e-05, %v445_v40  ;;  %v430_v8 = vmul.f32 %v1236_v27, %v1236_v27 }
 0x142   :  { %v578_v11 = vsub.f32 1.5, %v577_v49 }
 0x143   :  { %v688_v1 = vadd.f32 %v1207_v55, %v671_v52  ;;  %897 = vrsqrt.f32 %v461_v57  ;;  %vm510_vm3 = vweird.f32 %v461_v57 }
 0x144   :  { %v896_v58 = vpop.eup %895  ;;  %v579_v59 = vmul.f32 %v894_v25, %v578_v11  ;;  %v403_v60 = vpop.xlane.xlu1 %402  ;;  %v639_v11 = vsub.f32 %v1125_v23, %v1223_v6 }
 0x145   :  { %704 = vst [vmem:[#allocation2 + $0x10] sm:$0xff] %v688_v1  ;;  %v585_v62 = vmul.f32 %v896_v58, %v469_v32  ;;  %v387_v0 = vpop.xlane.xlu2 %386  ;;  %v389_v3 = vpop.xlane.xlu0 %388  ;;  %v422_v5 = vmul.f32 %v403_v60, %v1183_v4  ;;  %vm591_vm15 = vweird.f32 %v896_v58 }
 0x146   :  { %v583_v7 = vsel %vm582_vm14, %v894_v25, %v579_v59  ;;  %v414_v2 = vmul.f32 %v387_v0, %v1183_v4  ;;  %vm592_vm1 = vmor %vm590_vm0, %vm591_vm15  ;;  %v415_v42 = vmul.f32 %v389_v3, %v1183_v4 }
 0x147   :  { %v662_v9 = vmul.f32 %v646_v61, %v583_v7  ;;  %v586_v10 = vmul.f32 %v896_v58, %v585_v62  ;;  %v454_v12 = vsub.f32 %v422_v5, %v438_v63 }
 0x148   :  { %v446_v13 = vsub.f32 %v414_v2, %v430_v8 }
 0x149   :  { %v679_v16 = vmul.f32 %v1199_v48, %v662_v9  ;;  %v587_v51 = vmul.f32 0.5, %v586_v10  ;;  %v1248_v17 = vadd.f32 1e-05, %v454_v12  ;;  %v898_v18 = vpop.eup %897 }
 0x14a   :  { %v1250_v19 = vadd.f32 1e-05, %v446_v13  ;;  %v505_v15 = vmul.f32 %v898_v18, %v461_v57  ;;  %vm511_vm2 = vweird.f32 %v898_v18 }
 0x14b   :  { %v696_v20 = vadd.f32 %v1207_v55, %v679_v16  ;;  %v588_v21 = vsub.f32 1.5, %v587_v51  ;;  %vm512_vm4 = vmor %vm510_vm3, %vm511_vm2  ;;  %vm600_vm9 = vweird.f32 %v1248_v17 }
 0x14c   :  { %899 = vrsqrt.f32 %v1250_v19  ;;  %v1254_v24 = vpop.xlane.xlu1 %333  ;;  %v506_v26 = vmul.f32 %v898_v18, %v505_v15  ;;  %vm520_vm7 = vweird.f32 %v1250_v19  ;;  %v640_v15 = vsub.f32 %v1135_v31, %v1236_v27 }
 0x14d   :  { %712 = vst [vmem:[#allocation2 + $0x50] sm:$0xff] %v696_v20  ;;  %v589_v25 = vmul.f32 %v896_v58, %v588_v21  ;;  %901 = vrsqrt.f32 %v1248_v17  ;;  %v318_v29 = vpop.xlane.xlu2 %317  ;;  %v395_v30 = vpop.xlane.xlu0 %394 }
 0x14e   :  { %v1260_v35 = vmul.f32 %v1183_v4, %v318_v29  ;;  %v507_v37 = vmul.f32 0.5, %v506_v26  ;;  %v418_v8 = vmul.f32 %v395_v30, %v1183_v4  ;;  %v648_v29 = vsub.f32 %v1131_v28, %v1233_v54 }
 0x14f   :  { %v593_v36 = vsel %vm592_vm1, %v896_v58, %v589_v25 }
 0x150   :  { %v663_v39 = vmul.f32 %v647_v34, %v593_v36  ;;  %v431_v32 = vmul.f32 %v1260_v35, %v1260_v35  ;;  %v508_v43 = vsub.f32 1.5, %v507_v37 }
 0x152   :  { %v900_v45 = vpop.eup %899  ;;  %v680_v46 = vmul.f32 %v1199_v48, %v663_v39  ;;  %v447_v40 = vsub.f32 %v415_v42, %v431_v32  ;;  %v509_v22 = vmul.f32 %v898_v18, %v508_v43 }
 0x153   :  { %v902_v49 = vpop.eup %901  ;;  %v515_v14 = vmul.f32 %v900_v45, %v1250_v19  ;;  %vm521_vm5 = vweird.f32 %v900_v45 }
 0x154   :  { %v697_v52 = vadd.f32 %v1207_v55, %v680_v46  ;;  %v595_v1 = vmul.f32 %v902_v49, %v1248_v17  ;;  %v1271_v58 = vadd.f32 1e-05, %v447_v40  ;;  %v391_v59 = vpop.xlane.xlu1 %390  ;;  %v513_v60 = vsel %vm512_vm4, %v898_v18, %v509_v22  ;;  %vm522_vm8 = vmor %vm520_vm7, %vm521_vm5 }
 0x155   :  { %v516_v61 = vmul.f32 %v900_v45, %v515_v14  ;;  %v324_v62 = vpop.xlane.xlu2 %323  ;;  %v320_v63 = vpop.xlane.xlu0 %319  ;;  %v655_v0 = vmul.f32 %v639_v11, %v513_v60  ;;  %v416_v12 = vmul.f32 %v391_v59, %v1183_v4  ;;  %vm601_vm6 = vweird.f32 %v902_v49 }
 0x156   :  { %713 = vst [vmem:[#allocation2 + $0x58] sm:$0xff] %v697_v52  ;;  %v596_v57 = vmul.f32 %v902_v49, %v595_v1  ;;  %903 = vrsqrt.f32 %v1271_v58  ;;  %v1275_v5 = vmul.f32 %v1183_v4, %v324_v62  ;;  %v1278_v23 = vmul.f32 %v1183_v4, %v320_v63  ;;  %vm602_vm10 = vmor %vm600_vm9, %vm601_vm6 }
 0x157   :  { %v517_v3 = vmul.f32 0.5, %v516_v61  ;;  %v672_v6 = vmul.f32 %v1199_v48, %v655_v0  ;;  %vm530_vm12 = vweird.f32 %v1271_v58  ;;  %v641_v63 = vsub.f32 %v1139_v33, %v1260_v35 }
 0x158   :  { %v597_v7 = vmul.f32 0.5, %v596_v57  ;;  %v434_v9 = vmul.f32 %v1275_v5, %v1275_v5  ;;  %v432_v10 = vmul.f32 %v1278_v23, %v1278_v23  ;;  %v1321_v0 = vmul.f32 %v1183_v4, %v1254_v24 }
 0x159   :  { %v518_v2 = vsub.f32 1.5, %v517_v3  ;;  %v689_v13 = vadd.f32 %v1207_v55, %v672_v6 }
 0x15a   :  { %v598_v16 = vsub.f32 1.5, %v597_v7  ;;  %v450_v18 = vsub.f32 %v418_v8, %v434_v9  ;;  %v448_v20 = vsub.f32 %v416_v12, %v432_v10  ;;  %v439_v10 = vmul.f32 %v1321_v0, %v1321_v0 }
 0x15b   :  { %v519_v51 = vmul.f32 %v900_v45, %v518_v2  ;;  %705 = vst [vmem:[#allocation2 + $0x18] sm:$0xff] %v689_v13  ;;  %v644_v13 = vsub.f32 %v1147_v38, %v1275_v5 }
 0x15c   :  { %v904_v21 = vpop.eup %903  ;;  %v599_v25 = vmul.f32 %v902_v49, %v598_v16  ;;  %v397_v26 = vpop.xlane.xlu1 %396  ;;  %v1296_v34 = vadd.f32 1e-05, %v450_v18  ;;  %v1298_v27 = vadd.f32 1e-05, %v448_v20 }
 0x15d   :  { %v523_v30 = vsel %vm522_vm8, %v900_v45, %v519_v51  ;;  %v525_v19 = vmul.f32 %v904_v21, %v1271_v58  ;;  %v336_v36 = vpop.xlane.xlu2 %335  ;;  %v326_v37 = vpop.xlane.xlu0 %325  ;;  %vm531_vm11 = vweird.f32 %v904_v21  ;;  %v419_v22 = vmul.f32 %v397_v26, %v1183_v4 }
 0x15e   :  { %v656_v39 = vmul.f32 %v640_v15, %v523_v30  ;;  %v603_v31 = vsel %vm602_vm10, %v902_v49, %v599_v25  ;;  %905 = vrsqrt.f32 %v1296_v34  ;;  %v1305_v43 = vmul.f32 %v1183_v4, %v326_v37  ;;  %vm532_vm13 = vmor %vm530_vm12, %vm531_vm11 }
 0x15f   :  { %v664_v42 = vmul.f32 %v648_v29, %v603_v31  ;;  %v526_v32 = vmul.f32 %v904_v21, %v525_v19  ;;  %907 = vrsqrt.f32 %v1298_v27  ;;  %vm560_vm14 = vweird.f32 %v1296_v34 }
 0x160   :  { %v673_v17 = vmul.f32 %v1199_v48, %v656_v39  ;;  %v435_v49 = vmul.f32 %v1305_v43, %v1305_v43  ;;  %v1341_v51 = vmul.f32 %v1183_v4, %v336_v36  ;;  %vm540_vm1 = vweird.f32 %v1298_v27 }
 0x161   :  { %v681_v28 = vmul.f32 %v1199_v48, %v664_v42  ;;  %v527_v54 = vmul.f32 0.5, %v526_v32 }
 0x162   :  { %v690_v45 = vadd.f32 %v1207_v55, %v673_v17  ;;  %v451_v1 = vsub.f32 %v419_v22, %v435_v49  ;;  %v440_v42 = vmul.f32 %v1341_v51, %v1341_v51 }
 0x163   :  { %v698_v46 = vadd.f32 %v1207_v55, %v681_v28  ;;  %v528_v40 = vsub.f32 1.5, %v527_v54 }
 0x164   :  { %706 = vst [vmem:[#allocation2 + $0x20] sm:$0xff] %v690_v45  ;;  %v322_v14 = vpop.xlane.xlu1 %321  ;;  %v906_v52 = vpop.eup %905  ;;  %v1325_v6 = vadd.f32 1e-05, %v451_v1 }
 0x165   :  { %714 = vst [vmem:[#allocation2 + $0x60] sm:$0xff] %v698_v46  ;;  %v529_v11 = vmul.f32 %v904_v21, %v528_v40  ;;  %v393_v59 = vpop.xlane.xlu2 %392  ;;  %v338_v60 = vpop.xlane.xlu0 %337  ;;  %v1314_v61 = vmul.f32 %v1183_v4, %v322_v14  ;;  %v555_v57 = vmul.f32 %v906_v52, %v1296_v34  ;;  %vm561_vm15 = vweird.f32 %v906_v52 }
 0x166   :  { %v908_v62 = vpop.eup %907  ;;  %v417_v2 = vmul.f32 %v393_v59, %v1183_v4  ;;  %909 = vrsqrt.f32 %v1325_v6  ;;  %v1330_v33 = vmul.f32 %v1183_v4, %v338_v60  ;;  %vm562_vm2 = vmor %vm560_vm14, %vm561_vm15  ;;  %vm570_vm5 = vweird.f32 %v1325_v6 }
 0x167   :  { %v533_v3 = vsel %vm532_vm13, %v904_v21, %v529_v11  ;;  %v535_v58 = vmul.f32 %v908_v62, %v1298_v27  ;;  %v556_v8 = vmul.f32 %v906_v52, %v555_v57  ;;  %v433_v24 = vmul.f32 %v1314_v61, %v1314_v61 }
 0x168   :  { %v657_v7 = vmul.f32 %v641_v63, %v533_v3  ;;  %vm541_vm0 = vweird.f32 %v908_v62  ;;  %v441_v26 = vmul.f32 %v1330_v33, %v1330_v33  ;;  %v642_v27 = vsub.f32 %v1155_v44, %v1278_v23 }
 0x169   :  { %v536_v9 = vmul.f32 %v908_v62, %v535_v58  ;;  %v557_v12 = vmul.f32 0.5, %v556_v8  ;;  %v449_v18 = vsub.f32 %v417_v2, %v433_v24  ;;  %vm542_vm3 = vmor %vm540_vm1, %vm541_vm0  ;;  %v645_v58 = vsub.f32 %v1161_v47, %v1305_v43 }
 0x16a   :  { %v674_v35 = vmul.f32 %v1199_v48, %v657_v7 }
 0x16b   :  { %v537_v16 = vmul.f32 0.5, %v536_v9  ;;  %v558_v21 = vsub.f32 1.5, %v557_v12  ;;  %v1346_v29 = vadd.f32 1e-05, %v449_v18 }
 0x16c   :  { %v691_v20 = vadd.f32 %v1207_v55, %v674_v35  ;;  %v409_v15 = vpop.xlane.xlu1 %408  ;;  %v910_v39 = vpop.eup %909 }
 0x16d   :  { %v538_v25 = vsub.f32 1.5, %v537_v16  ;;  %v405_v38 = vpop.xlane.xlu2 %404  ;;  %v407_v5 = vpop.xlane.xlu0 %406  ;;  %v425_v30 = vmul.f32 %v409_v15, %v1183_v4  ;;  %v559_v19 = vmul.f32 %v906_v52, %v558_v21  ;;  %911 = vrsqrt.f32 %v1346_v29 }
 0x16e   :  { %707 = vst [vmem:[#allocation2 + $0x28] sm:$0xff] %v691_v20  ;;  %v423_v36 = vmul.f32 %v405_v38, %v1183_v4  ;;  %v424_v37 = vmul.f32 %v407_v5, %v1183_v4  ;;  %v565_v4 = vmul.f32 %v910_v39, %v1325_v6  ;;  %vm571_vm4 = vweird.f32 %v910_v39 }
 0x16f   :  { %v539_v31 = vmul.f32 %v908_v62, %v538_v25  ;;  %v457_v32 = vsub.f32 %v425_v30, %v441_v26  ;;  %v563_v17 = vsel %vm562_vm2, %v906_v52, %v559_v19  ;;  %vm572_vm6 = vmor %vm570_vm5, %vm571_vm4  ;;  %vm550_vm8 = vweird.f32 %v1346_v29 }
 0x170   :  { %v455_v28 = vsub.f32 %v423_v36, %v439_v10  ;;  %v660_v54 = vmul.f32 %v644_v13, %v563_v17  ;;  %v456_v34 = vsub.f32 %v424_v37, %v440_v42  ;;  %v566_v49 = vmul.f32 %v910_v39, %v565_v4 }
 0x171   :  { %v543_v45 = vsel %vm542_vm3, %v908_v62, %v539_v31  ;;  %v473_v46 = vadd.f32 1e-05, %v457_v32  ;;  %v643_v15 = vsub.f32 %v1169_v53, %v1314_v61  ;;  %v651_v37 = vsub.f32 %v1171_v56, %v1330_v33 }
 0x172   :  { %v658_v40 = vmul.f32 %v642_v27, %v543_v45  ;;  %v471_v22 = vadd.f32 1e-05, %v455_v28  ;;  %v677_v14 = vmul.f32 %v1199_v48, %v660_v54  ;;  %v1363_v11 = vadd.f32 1e-05, %v456_v34 }
 0x173   :  { %913 = vrsqrt.f32 %v473_v46  ;;  %v567_v44 = vmul.f32 0.5, %v566_v49  ;;  %v912_v23 = vpop.eup %911  ;;  %vm630_vm13 = vweird.f32 %v473_v46  ;;  %v649_v53 = vsub.f32 %v1149_v41, %v1321_v0 }
 0x174   :  { %v675_v52 = vmul.f32 %v1199_v48, %v658_v40  ;;  %915 = vrsqrt.f32 %v471_v22  ;;  %v694_v1 = vadd.f32 %v1207_v55, %v677_v14  ;;  %v545_v62 = vmul.f32 %v912_v23, %v1346_v29 }
 0x175   :  { %917 = vrsqrt.f32 %v1363_v11  ;;  %v568_v60 = vsub.f32 1.5, %v567_v44  ;;  %vm551_vm7 = vweird.f32 %v912_v23  ;;  %vm610_vm14 = vweird.f32 %v471_v22 }
 0x176   :  { %v692_v59 = vadd.f32 %v1207_v55, %v675_v52  ;;  %710 = vst [vmem:[#allocation2 + $0x40] sm:$0xff] %v694_v1  ;;  %v546_v57 = vmul.f32 %v912_v23, %v545_v62  ;;  %vm552_vm9 = vmor %vm550_vm8, %vm551_vm7  ;;  %vm620_vm1 = vweird.f32 %v1363_v11  ;;  %v650_v32 = vsub.f32 %v1163_v50, %v1341_v51 }
 0x177   :  { %v569_v63 = vmul.f32 %v910_v39, %v568_v60 }
 0x178   :  { %708 = vst [vmem:[#allocation2 + $0x30] sm:$0xff] %v692_v59  ;;  %v547_v2 = vmul.f32 0.5, %v546_v57 }
 0x179   :  { %v914_v3 = vpop.eup %913  ;;  %v573_v8 = vsel %vm572_vm6, %v910_v39, %v569_v63 }
 0x17a   :  { %v916_v7 = vpop.eup %915  ;;  %v625_v9 = vmul.f32 %v914_v3, %v473_v46  ;;  %v661_v35 = vmul.f32 %v645_v58, %v573_v8  ;;  %v548_v12 = vsub.f32 1.5, %v547_v2  ;;  %vm631_vm10 = vweird.f32 %v914_v3 }
 0x17b   :  { %v918_v24 = vpop.eup %917  ;;  %v605_v10 = vmul.f32 %v916_v7, %v471_v22  ;;  %vm611_vm11 = vweird.f32 %v916_v7  ;;  %vm632_vm15 = vmor %vm630_vm13, %vm631_vm10 }
 0x17c   :  { %v615_v13 = vmul.f32 %v918_v24, %v1363_v11  ;;  %v626_v16 = vmul.f32 %v914_v3, %v625_v9  ;;  %v678_v6 = vmul.f32 %v1199_v48, %v661_v35  ;;  %v549_v20 = vmul.f32 %v912_v23, %v548_v12  ;;  %vm612_vm0 = vmor %vm610_vm14, %vm611_vm11 }
 0x17d   :  { %v606_v18 = vmul.f32 %v916_v7, %v605_v10  ;;  %vm621_vm12 = vweird.f32 %v918_v24 }
 0x17e   :  { %v616_v47 = vmul.f32 %v918_v24, %v615_v13  ;;  %v627_v43 = vmul.f32 0.5, %v626_v16  ;;  %v695_v21 = vadd.f32 %v1207_v55, %v678_v6  ;;  %v553_v26 = vsel %vm552_vm9, %v912_v23, %v549_v20  ;;  %vm622_vm2 = vmor %vm620_vm1, %vm621_vm12 }
 0x17f   :  { %v607_v25 = vmul.f32 0.5, %v606_v18  ;;  %v659_v30 = vmul.f32 %v643_v15, %v553_v26 }
 0x180   :  { %v617_v38 = vmul.f32 0.5, %v616_v47  ;;  %v628_v5 = vsub.f32 1.5, %v627_v43  ;;  %711 = vst [vmem:[#allocation2 + $0x48] sm:$0xff] %v695_v21 }
 0x181   :  { %v608_v19 = vsub.f32 1.5, %v607_v25  ;;  %v676_v39 = vmul.f32 %v1199_v48, %v659_v30 }
 0x182   :  { %v618_v36 = vsub.f32 1.5, %v617_v38  ;;  %v629_v29 = vmul.f32 %v914_v3, %v628_v5 }
 0x183   :  { %v609_v31 = vmul.f32 %v916_v7, %v608_v19  ;;  %v693_v17 = vadd.f32 %v1207_v55, %v676_v39 }
 0x184   :  { %v619_v61 = vmul.f32 %v918_v24, %v618_v36  ;;  %v633_v42 = vsel %vm632_vm15, %v914_v3, %v629_v29 }
 0x185   :  { %v613_v27 = vsel %vm612_vm0, %v916_v7, %v609_v31  ;;  %v667_v56 = vmul.f32 %v651_v37, %v633_v42  ;;  %709 = vst [vmem:[#allocation2 + $0x38] sm:$0xff] %v693_v17 }
 0x186   :  { %v665_v33 = vmul.f32 %v649_v53, %v613_v27  ;;  %v623_v4 = vsel %vm622_vm2, %v918_v24, %v619_v61 }
 0x187   :  { %v666_v28 = vmul.f32 %v650_v32, %v623_v4  ;;  %v684_v41 = vmul.f32 %v1199_v48, %v667_v56 }
 0x188   :  { %v682_v50 = vmul.f32 %v1199_v48, %v665_v33 }
 0x189   :  { %v683_v0 = vmul.f32 %v1199_v48, %v666_v28  ;;  %v701_v51 = vadd.f32 %v1207_v55, %v684_v41 }
 0x18a   :  { %v699_v54 = vadd.f32 %v1207_v55, %v682_v50 }
 0x18b   :  { %v700_v45 = vadd.f32 %v1207_v55, %v683_v0  ;;  %717 = vst [vmem:[#allocation2 + $0x78] sm:$0xff] %v701_v51 }
 0x18c   :  { %715 = vst [vmem:[#allocation2 + $0x68] sm:$0xff] %v699_v54 }
 0x18d   :  { %716 = vst [vmem:[#allocation2 + $0x70] sm:$0xff] %v700_v45 }
 0x18e   :  { %730 = dma.vmem_to_hbm [thread:$0]  %s723_s16, 2048, %s725_s19, [#allocation3], %s947_s20, %s947_s20, %s948_s21  }
 0x18f   :  { %943 = dma.done.wait [#allocation3], 2048  }
 0x190   :  { %944 = vsyncadd [#allocation3], 4294965248 }
 0x191   :  { %735 = vsyncpa [#allocation3], 1 }

</bundles_post_ra>
